<compile_context>
chip_gen: v6e
topology: v6e:2x2x1
jax: 0.10.0
libtpu: 0.0.40
codegen_flags: <defaults>
</compile_context>

<pallas_src>
import jax
import jax.numpy as jnp
from jax.experimental import pallas as pl
from jax.experimental.pallas import tpu as pltpu

# ----- small, fixed problem sizes (consistent with a tiny Yolact) -----
B, CIN, H, W = 2, 3, 16, 16      # images: [B, 3, 16, 16] (NCHW at the API boundary)
CH = 32                          # backbone channels
NUM_CLASSES = 4                  # including background class 0
MASK_DIM = 8                     # mask coefficient dimension
P = H * W                        # one prior per spatial cell
M = B * P                        # flattened rows (512, lane-dense: multiple of 128)
K = 3 * 3 * CIN                  # im2col feature size (27)

KPAD = 32                        # 27 im2col + 1 ones-row (bias) + 4 zero pad
CHPAD = 48                       # CH feats + 1 constant-one row + 15 zero pad (mult of 16)

# Sublane-aligned packed head layout (each group starts at a multiple of 8):
HEAD_ROWS = 32                   # total packed/padded head output rows
LOC0, LOC1 = 0, 4                # loc  in rows 0-3   (rows 4-7 zero pad)
LOC_GRP = 8                      # full group used for the smooth-L1 (pad rows are zero)
CONF0, CONF1 = 8, 8 + NUM_CLASSES            # conf in rows 8-11  (rows 12-15 zero pad)
MASK0, MASK1 = 16, 16 + MASK_DIM             # mask in rows 16-23
POS_ROW = 24                     # positives indicator row in the target slab
TGT_PAD = 32                     # target slab rows (mirrors HEAD_ROWS)

BOX_ALPHA = 1.5
MASK_ALPHA = 6.125


# --------------------------------------------------------------------------
# Fused kernel: model forward + MultiBox-style loss -> 3 scalars in SMEM
#   patches_ref : [KPAD, M]       bf16  (im2col, transposed, ones-row at index K)
#   wc_ref      : [CHPAD, KPAD]   bf16  (backbone weight; bias column; ones-selector row)
#   wh_ref      : [HEAD_ROWS, CHPAD] bf16 (packed heads; bias column at CH)
#   tgt_ref     : [TGT_PAD, M]    f32   (loc | 0 | conf one-hot | 0 | maskc | pos | 0)
#   out_ref     : [3] f32 in SMEM (B, C, M losses)
# --------------------------------------------------------------------------
def _fused_kernel(patches_ref, wc_ref, wh_ref, tgt_ref, out_ref):
    # backbone conv as matmul (bias folded via ones row) + ReLU; row CH stays == 1.
    feat = jnp.dot(wc_ref[...], patches_ref[...],
                   preferred_element_type=jnp.float32)            # [CHPAD, M]
    feat = jnp.maximum(feat, 0.0)

    # packed prediction heads (loc | conf | mask-coeff); head biases folded via feat row CH.
    heads = jnp.dot(wh_ref[...], feat.astype(wh_ref.dtype),
                    preferred_element_type=jnp.float32)           # [HEAD_ROWS, M]

    tgt = tgt_ref[...]
    pos = tgt[POS_ROW:POS_ROW + 1, :]                             # [1, M], 0/1 float
    num_pos = jnp.maximum(jnp.sum(pos, axis=1, keepdims=True), 1.0)   # [1, 1]
    inv_np = pl.reciprocal(num_pos, approx=False)[0, 0]           # exact, single scalar

    # -- localization: smooth L1 over positive priors.
    # Computed over the full 8-row sublane group: rows 4-7 are exactly zero in both
    # heads (zero weight rows + zero bias) and targets, so they contribute nothing.
    d = heads[LOC0:LOC0 + LOC_GRP, :] - tgt[LOC0:LOC0 + LOC_GRP, :]
    ad = jnp.abs(d)
    sl1 = jnp.where(ad < 1.0, 0.5 * d * d, ad - 0.5)
    loss_b = jnp.sum(sl1 * pos) * BOX_ALPHA

    # -- confidence: softmax cross-entropy over all priors (class axis = sublanes 8-11).
    # TODO(synk): OHEM hard-negative mining (3:1 neg:pos) from MultiBoxLoss is not implemented.
    logits = heads[CONF0:CONF1, :]
    mx = jnp.max(logits, axis=0, keepdims=True)
    z = logits - mx
    lse = jnp.log(jnp.sum(jnp.exp(z), axis=0, keepdims=True))
    ce = -jnp.sum(tgt[CONF0:CONF1, :] * (z - lse), axis=0, keepdims=True)
    loss_c = jnp.sum(ce)

    # -- mask: MSE on tanh mask coefficients of positive priors (full group 16-23).
    # TODO(synk): true YOLACT mask loss (prototype combination + cropped BCE) not implemented.
    maskc = jnp.tanh(heads[MASK0:MASK1, :])
    dm = maskc - tgt[MASK0:MASK1, :]
    loss_m = jnp.sum(dm * dm * pos) * MASK_ALPHA

    out_ref[0] = loss_b * inv_np
    out_ref[1] = loss_c * inv_np
    out_ref[2] = loss_m * inv_np


def run_fused(patchesT, wcT, whT, tgtT):
    losses = pl.pallas_call(
        _fused_kernel,
        out_shape=jax.ShapeDtypeStruct((3,), jnp.float32),
        in_specs=[pl.BlockSpec(memory_space=pltpu.MemorySpace.VMEM)] * 4,
        out_specs=pl.BlockSpec(memory_space=pltpu.MemorySpace.SMEM),
    )(patchesT, wcT, whT, tgtT)
    return {"B": losses[0], "C": losses[1], "M": losses[2]}


# --------------------------------------------------------------------------
# Glue (plain JAX): im2col + lane-dense packing, prior matching, target encoding
# --------------------------------------------------------------------------
def im2col_3x3_T(x_nchw):
    x = jnp.transpose(x_nchw, (0, 2, 3, 1))                     # NCHW -> NHWC
    xp = jnp.pad(x, ((0, 0), (1, 1), (1, 1), (0, 0)))
    pats = [xp[:, dy:dy + H, dx:dx + W, :] for dy in range(3) for dx in range(3)]
    pat = jnp.concatenate(pats, axis=-1).reshape(M, K)          # [M, 27]
    pat = jnp.concatenate(
        [pat,
         jnp.ones((M, 1), jnp.float32),                         # ones column -> bias fold
         jnp.zeros((M, KPAD - K - 1), jnp.float32)], axis=-1)   # [M, 32]
    return pat.T.astype(jnp.bfloat16)                           # [KPAD, M] lane-dense


def pack_weights(params):
    """Called ONCE outside the jitted step: weights stay packed/transposed in HBM."""
    # backbone: [CHPAD, KPAD]; column K holds the bias (pairs with the patches ones row),
    # row CH is a ones-selector so feat row CH == 1 (lets the head biases fold too).
    wcT = jnp.concatenate(
        [params["wc"].T,                                        # [CH, K]
         params["bc"].T,                                        # [CH, 1] bias column
         jnp.zeros((CH, KPAD - K - 1), jnp.float32)], axis=1)   # [CH, KPAD]
    ones_selector = jnp.zeros((1, KPAD), jnp.float32).at[0, K].set(1.0)
    wcT = jnp.concatenate(
        [wcT, ones_selector,
         jnp.zeros((CHPAD - CH - 1, KPAD), jnp.float32)], axis=0)   # [CHPAD, KPAD]

    # packed heads: [HEAD_ROWS, CHPAD]; sublane-aligned groups with zero pad rows;
    # column CH holds the concatenated head biases (pairs with feat ones row).
    z4 = jnp.zeros((4, CH), jnp.float32)
    wh = jnp.concatenate(
        [params["wl"].T, z4,                                    # rows  0-7
         params["wcf"].T, z4,                                   # rows  8-15
         params["wm"].T,                                        # rows 16-23
         jnp.zeros((HEAD_ROWS - MASK1, CH), jnp.float32)], axis=0)   # rows 24-31
    bh = jnp.concatenate(
        [params["bl"][0], jnp.zeros((4,), jnp.float32),
         params["bcf"][0], jnp.zeros((4,), jnp.float32),
         params["bm"][0], jnp.zeros((HEAD_ROWS - MASK1,), jnp.float32)],
        axis=0)[:, None]                                        # [HEAD_ROWS, 1]
    whT = jnp.concatenate(
        [wh, bh, jnp.zeros((HEAD_ROWS, CHPAD - CH - 1), jnp.float32)], axis=1)

    return wcT.astype(jnp.bfloat16), whT.astype(jnp.bfloat16)


def pack_targets(loc_t, conf_t, pos, maskc_t):
    z4 = jnp.zeros((B, P, 4), jnp.float32)
    tgt = jnp.concatenate(
        [loc_t, z4,                                             # rows  0-7
         conf_t, z4,                                            # rows  8-15
         maskc_t,                                               # rows 16-23
         pos,                                                   # row  24
         jnp.zeros((B, P, TGT_PAD - POS_ROW - 1), jnp.float32)], axis=-1)  # rows 25-31
    return tgt.reshape(M, TGT_PAD).T                            # [32, M] f32, lane-dense


def build_targets(targets, masks, num_crowds, mask_basis):
    # targets: [B, n_obj, 5] = (cx, cy, w, h, label), normalized coords
    # masks:   [B, n_obj, H, W]
    # TODO(synk): full IoU-based matching, box encoding with variances, and crowd
    #             handling via num_crowds are simplified to center-distance matching.
    del num_crowds
    ys, xs = jnp.meshgrid(jnp.arange(H), jnp.arange(W), indexing="ij")
    prior_cx = (xs.reshape(-1).astype(jnp.float32) + 0.5) / W      # [P]
    prior_cy = (ys.reshape(-1).astype(jnp.float32) + 0.5) / H

    gt_cx = targets[:, :, 0]                                       # [B, n_obj]
    gt_cy = targets[:, :, 1]
    dist = ((prior_cx[None, :, None] - gt_cx[:, None, :]) ** 2 +
            (prior_cy[None, :, None] - gt_cy[:, None, :]) ** 2)    # [B, P, n_obj]
    best = jnp.argmin(dist, axis=-1)                               # [B, P]
    best_d = jnp.min(dist, axis=-1)
    pos = (best_d < (2.0 / H) ** 2).astype(jnp.float32)[..., None] # [B, P, 1]

    bidx = jnp.arange(B)[:, None]
    g = targets[bidx, best]                                        # [B, P, 5]
    loc_t = jnp.stack([
        (g[..., 0] - prior_cx[None, :]) * W,
        (g[..., 1] - prior_cy[None, :]) * H,
        jnp.log(jnp.maximum(g[..., 2], 1e-3)),
        jnp.log(jnp.maximum(g[..., 3], 1e-3)),
    ], axis=-1)                                                    # [B, P, 4]

    label = g[..., 4].astype(jnp.int32) * pos[..., 0].astype(jnp.int32)  # bg=0 for negatives
    conf_t = jax.nn.one_hot(label, NUM_CLASSES, dtype=jnp.float32)       # [B, P, C]

    gm = masks[bidx, best]                                         # [B, P, H, W]
    maskc_t = jnp.einsum("bphw,hwd->bpd", gm, mask_basis) / float(H * W)
    return loc_t, conf_t, pos, maskc_t


def init_params(key):
    ks = jax.random.split(key, 5)
    params = {
        "wc": 0.1 * jax.random.normal(ks[0], (K, CH), jnp.float32),
        "bc": jnp.zeros((1, CH), jnp.float32),
        "wl": 0.1 * jax.random.normal(ks[1], (CH, 4), jnp.float32),
        "bl": jnp.zeros((1, 4), jnp.float32),
        "wcf": 0.1 * jax.random.normal(ks[2], (CH, NUM_CLASSES), jnp.float32),
        "bcf": jnp.zeros((1, NUM_CLASSES), jnp.float32),
        "wm": 0.1 * jax.random.normal(ks[3], (CH, MASK_DIM), jnp.float32),
        "bm": jnp.zeros((1, MASK_DIM), jnp.float32),
        "mask_basis": jax.random.normal(ks[4], (H, W, MASK_DIM), jnp.float32),
    }
    return params


@jax.jit
def model_loss(wcT, whT, mask_basis, images, targets, masks, num_crowds):
    """ModelLoss.forward: preds = model(images); losses = criterion(model, preds, ...)."""
    patchesT = im2col_3x3_T(images)                                # [KPAD, M] bf16
    loc_t, conf_t, pos, maskc_t = build_targets(targets, masks, num_crowds, mask_basis)
    tgtT = pack_targets(loc_t, conf_t, pos, maskc_t)               # [TGT_PAD, M] f32
    return run_fused(patchesT, wcT, whT, tgtT)


if __name__ == "__main__":
    key = jax.random.PRNGKey(0)
    k_img, k_box, k_lbl, k_msk, k_par = jax.random.split(key, 5)

    images = jax.random.normal(k_img, (B, CIN, H, W), jnp.float32)     # NCHW, like PyTorch
    n_obj = 3
    boxes = jax.random.uniform(k_box, (B, n_obj, 4), minval=0.1, maxval=0.9)
    labels = jax.random.randint(k_lbl, (B, n_obj, 1), 1, NUM_CLASSES).astype(jnp.float32)
    targets = jnp.concatenate([boxes, labels], axis=-1)                # [B, n_obj, 5]
    masks = (jax.random.uniform(k_msk, (B, n_obj, H, W)) > 0.5).astype(jnp.float32)
    num_crowds = jnp.zeros((B,), jnp.int32)

    params = init_params(k_par)
    wcT, whT = pack_weights(params)            # packed once, outside the jitted step

    losses = model_loss(wcT, whT, params["mask_basis"],
                        images, targets, masks, num_crowds)
    losses = {k: jax.block_until_ready(v) for k, v in losses.items()}
    assert all(jnp.isfinite(v) for v in losses.values())
    print("KERNEL_OK")
</pallas_src>

<mosaic_0001>
module attributes {stable_mosaic.version = 11 : i64} {
  func.func @_fused_kernel(%arg0: memref<32x512xbf16, #tpu.memory_space<vmem>>, %arg1: memref<48x32xbf16, #tpu.memory_space<vmem>>, %arg2: memref<32x48xbf16, #tpu.memory_space<vmem>>, %arg3: memref<32x512xf32, #tpu.memory_space<vmem>>, %arg4: memref<3xf32, #tpu.memory_space<smem>>) attributes {dimension_semantics = [], scalar_prefetch = 0 : i64, scratch_operands = 0 : i64, tpu.core_type = #tpu.core_type<tc>} {
    %c0 = arith.constant 0 : index
    %c0_0 = arith.constant 0 : index
    %0 = vector.load %arg1[%c0, %c0_0] : memref<48x32xbf16, #tpu.memory_space<vmem>>, vector<48x32xbf16>
    %c0_1 = arith.constant 0 : index
    %c0_2 = arith.constant 0 : index
    %1 = vector.load %arg0[%c0_1, %c0_2] : memref<32x512xbf16, #tpu.memory_space<vmem>>, vector<32x512xbf16>
    %cst = arith.constant dense<0.000000e+00> : vector<48x512xf32>
    %2 = tpu.matmul %0, %1, %cst {dimension_numbers = #tpu.dot_dimension_numbers<[1], [0], [0], [1], [0, 0, 1, 1], [], []>} : vector<48x32xbf16>, vector<32x512xbf16>, vector<48x512xf32> -> vector<48x512xf32>
    %cst_3 = arith.constant 0.000000e+00 : f32
    %3 = vector.broadcast %cst_3 : f32 to vector<48x512xf32>
    %4 = arith.maximumf %2, %3 : vector<48x512xf32>
    %c0_4 = arith.constant 0 : index
    %c0_5 = arith.constant 0 : index
    %5 = vector.load %arg2[%c0_4, %c0_5] : memref<32x48xbf16, #tpu.memory_space<vmem>>, vector<32x48xbf16>
    %6 = arith.truncf %4 : vector<48x512xf32> to vector<48x512xbf16>
    %cst_6 = arith.constant dense<0.000000e+00> : vector<32x512xf32>
    %7 = tpu.matmul %5, %6, %cst_6 {dimension_numbers = #tpu.dot_dimension_numbers<[1], [0], [0], [1], [0, 0, 1, 1], [], []>} : vector<32x48xbf16>, vector<48x512xbf16>, vector<32x512xf32> -> vector<32x512xf32>
    %c0_7 = arith.constant 0 : index
    %c0_8 = arith.constant 0 : index
    %8 = vector.load %arg3[%c0_7, %c0_8] : memref<32x512xf32, #tpu.memory_space<vmem>>, vector<32x512xf32>
    %9 = vector.extract_strided_slice %8 {offsets = [24, 0], sizes = [1, 512], strides = [1, 1]} : vector<32x512xf32> to vector<1x512xf32>
    %cst_9 = arith.constant dense<0.000000e+00> : vector<1xf32>
    %10 = vector.multi_reduction <add>, %9, %cst_9 [1] : vector<1x512xf32> to vector<1xf32>
    %11 = vector.shape_cast %10 : vector<1xf32> to vector<1x1xf32>
    %cst_10 = arith.constant 1.000000e+00 : f32
    %12 = vector.broadcast %cst_10 : f32 to vector<1x1xf32>
    %13 = arith.maximumf %11, %12 : vector<1x1xf32>
    %14 = tpu.reciprocal %13 : vector<1x1xf32> -> vector<1x1xf32>
    %15 = vector.extract %14[0, 0] : f32 from vector<1x1xf32>
    %16 = vector.extract_strided_slice %7 {offsets = [0, 0], sizes = [8, 512], strides = [1, 1]} : vector<32x512xf32> to vector<8x512xf32>
    %17 = vector.extract_strided_slice %8 {offsets = [0, 0], sizes = [8, 512], strides = [1, 1]} : vector<32x512xf32> to vector<8x512xf32>
    %18 = arith.subf %16, %17 : vector<8x512xf32>
    %19 = math.absf %18 : vector<8x512xf32>
    %cst_11 = arith.constant 1.000000e+00 : f32
    %20 = vector.broadcast %cst_11 : f32 to vector<8x512xf32>
    %21 = arith.cmpf olt, %19, %20 : vector<8x512xf32>
    %cst_12 = arith.constant 5.000000e-01 : f32
    %22 = vector.broadcast %cst_12 : f32 to vector<8x512xf32>
    %23 = arith.mulf %22, %18 : vector<8x512xf32>
    %24 = arith.mulf %23, %18 : vector<8x512xf32>
    %cst_13 = arith.constant 5.000000e-01 : f32
    %25 = vector.broadcast %cst_13 : f32 to vector<8x512xf32>
    %26 = arith.subf %19, %25 : vector<8x512xf32>
    %27 = arith.select %21, %24, %26 : vector<8x512xi1>, vector<8x512xf32>
    %28 = vector.broadcast %9 : vector<1x512xf32> to vector<8x512xf32>
    %29 = arith.mulf %27, %28 : vector<8x512xf32>
    %30 = vector.shape_cast %29 : vector<8x512xf32> to vector<1x8x512xf32>
    %cst_14 = arith.constant dense<0.000000e+00> : vector<1xf32>
    %31 = vector.multi_reduction <add>, %30, %cst_14 [1, 2] : vector<1x8x512xf32> to vector<1xf32>
    %32 = vector.shape_cast %31 : vector<1xf32> to vector<1x1x1xf32>
    %33 = vector.extract %32[0, 0, 0] : f32 from vector<1x1x1xf32>
    %cst_15 = arith.constant 1.500000e+00 : f32
    %34 = arith.mulf %33, %cst_15 : f32
    %35 = vector.extract_strided_slice %7 {offsets = [8, 0], sizes = [4, 512], strides = [1, 1]} : vector<32x512xf32> to vector<4x512xf32>
    %cst_16 = arith.constant dense<0xFF800000> : vector<512xf32>
    %36 = vector.multi_reduction <maximumf>, %35, %cst_16 [0] : vector<4x512xf32> to vector<512xf32>
    %37 = vector.shape_cast %36 : vector<512xf32> to vector<1x512xf32>
    %38 = vector.broadcast %37 : vector<1x512xf32> to vector<4x512xf32>
    %39 = arith.subf %35, %38 : vector<4x512xf32>
    %40 = math.exp %39 : vector<4x512xf32>
    %cst_17 = arith.constant dense<0.000000e+00> : vector<512xf32>
    %41 = vector.multi_reduction <add>, %40, %cst_17 [0] : vector<4x512xf32> to vector<512xf32>
    %42 = vector.shape_cast %41 : vector<512xf32> to vector<1x512xf32>
    %43 = math.log %42 : vector<1x512xf32>
    %44 = vector.extract_strided_slice %8 {offsets = [8, 0], sizes = [4, 512], strides = [1, 1]} : vector<32x512xf32> to vector<4x512xf32>
    %45 = vector.broadcast %43 : vector<1x512xf32> to vector<4x512xf32>
    %46 = arith.subf %39, %45 : vector<4x512xf32>
    %47 = arith.mulf %44, %46 : vector<4x512xf32>
    %cst_18 = arith.constant dense<0.000000e+00> : vector<512xf32>
    %48 = vector.multi_reduction <add>, %47, %cst_18 [0] : vector<4x512xf32> to vector<512xf32>
    %49 = vector.shape_cast %48 : vector<512xf32> to vector<1x512xf32>
    %cst_19 = arith.constant 0.000000e+00 : f32
    %50 = vector.broadcast %cst_19 : f32 to vector<1x512xf32>
    %51 = arith.subf %50, %49 : vector<1x512xf32>
    %52 = vector.shape_cast %51 : vector<1x512xf32> to vector<1x1x512xf32>
    %cst_20 = arith.constant dense<0.000000e+00> : vector<1xf32>
    %53 = vector.multi_reduction <add>, %52, %cst_20 [1, 2] : vector<1x1x512xf32> to vector<1xf32>
    %54 = vector.shape_cast %53 : vector<1xf32> to vector<1x1x1xf32>
    %55 = vector.extract %54[0, 0, 0] : f32 from vector<1x1x1xf32>
    %56 = vector.extract_strided_slice %7 {offsets = [16, 0], sizes = [8, 512], strides = [1, 1]} : vector<32x512xf32> to vector<8x512xf32>
    %57 = math.tanh %56 : vector<8x512xf32>
    %58 = vector.extract_strided_slice %8 {offsets = [16, 0], sizes = [8, 512], strides = [1, 1]} : vector<32x512xf32> to vector<8x512xf32>
    %59 = arith.subf %57, %58 : vector<8x512xf32>
    %60 = arith.mulf %59, %59 : vector<8x512xf32>
    %61 = vector.broadcast %9 : vector<1x512xf32> to vector<8x512xf32>
    %62 = arith.mulf %60, %61 : vector<8x512xf32>
    %63 = vector.shape_cast %62 : vector<8x512xf32> to vector<1x8x512xf32>
    %cst_21 = arith.constant dense<0.000000e+00> : vector<1xf32>
    %64 = vector.multi_reduction <add>, %63, %cst_21 [1, 2] : vector<1x8x512xf32> to vector<1xf32>
    %65 = vector.shape_cast %64 : vector<1xf32> to vector<1x1x1xf32>
    %66 = vector.extract %65[0, 0, 0] : f32 from vector<1x1x1xf32>
    %cst_22 = arith.constant 6.125000e+00 : f32
    %67 = arith.mulf %66, %cst_22 : f32
    %68 = arith.mulf %34, %15 : f32
    %c0_23 = arith.constant 0 : index
    %69 = memref.load %arg4[%c0_23] : memref<3xf32, #tpu.memory_space<smem>>
    memref.store %68, %arg4[%c0_23] : memref<3xf32, #tpu.memory_space<smem>>
    %70 = arith.mulf %55, %15 : f32
    %c1 = arith.constant 1 : index
    %71 = memref.load %arg4[%c1] : memref<3xf32, #tpu.memory_space<smem>>
    memref.store %70, %arg4[%c1] : memref<3xf32, #tpu.memory_space<smem>>
    %72 = arith.mulf %67, %15 : f32
    %c2 = arith.constant 2 : index
    %73 = memref.load %arg4[%c2] : memref<3xf32, #tpu.memory_space<smem>>
    memref.store %72, %arg4[%c2] : memref<3xf32, #tpu.memory_space<smem>>
    return
  }
}

</mosaic_0001>

<bundles_post_ra>
// kernel: model_loss.1
= control target key start
LH: loop header
LB: loop body
LE: loop exit
PB: predicated region body
PF: predicated region fallthrough
CT: control target
= control target key end

     0   :  { %v753_v2 = vmov 0   ;;  %vm88_vm0 = vcmask 261120   ;;  %s987_s0 = inlined_call_operand.vmem [shape: bf16[32,512], index: 0, kind: input, shape index: {}]   ;;  %s988_s1 = inlined_call_operand.vmem [shape: bf16[48,32], index: 1, kind: input, shape index: {}]   ;;  %s989_s2 = inlined_call_operand.vmem [shape: bf16[32,48], index: 2, kind: input, shape index: {}]   ;;  %s990_s3 = inlined_call_operand.vmem [shape: f32[32,512], index: 3, kind: input, shape index: {}]   ;;  %s991_s4 = inlined_call_operand.vmem [shape: f32[3], index: 4, kind: output, shape index: {}]  }
   0x1   :  { %v696_v0 = vld [vmem:[%s987_s0 + $0x24] ss:$16 sps:$4 sm:$0xff]   ;;  %v698_v1 = vld [vmem:[%s987_s0 + $0x2c] ss:$16 sps:$4 sm:$0xff]   ;;  %130 = vmatprep.mubr.bf16.mxu0 %v753_v2  ;;  %193 = vmatprep.mubr.bf16.mxu1 %v753_v2  ;;  %v700_v3 = vld [vmem:[%s987_s0 + $0x20] ss:$16 sps:$4 sm:$0xff]  }
   0x2   :  { %110 = vmatprep.subr.bf16.mxu0 %v696_v0  ;;  %v701_v4 = vld [vmem:[%s987_s0 + $0x28] ss:$16 sps:$4 sm:$0xff]   ;;  %173 = vmatprep.subr.bf16.mxu1 %v698_v1  ;;  %v702_v5 = vld [vmem:[%s987_s0 + $0x4] ss:$16 sps:$4 sm:$0xff]   ;;  %v704_v6 = vld [vmem:[%s987_s0 + $0xc] ss:$16 sps:$4 sm:$0xff]  }
   0x3   :  { %111 = vmatpush1.bf16.msra.mxu0 %v700_v3  ;;  %174 = vmatpush1.bf16.msra.mxu1 %v701_v4  ;;  %v706_v7 = vld [vmem:[%s987_s0] ss:$16 sps:$4 sm:$0xff]   ;;  %v707_v8 = vld [vmem:[%s987_s0 + $0x8] ss:$16 sps:$4 sm:$0xff]  }
   0x4   :  { %112 = vmatprep.subr.bf16.mxu0 %v702_v5  ;;  %175 = vmatprep.subr.bf16.mxu1 %v704_v6  ;;  %v708_v9 = vld [vmem:[%s988_s1] sm:$0xff]  }
   0x7   :  { %113 = vmatpush1.bf16.msra.mxu0 %v706_v7  ;;  %176 = vmatpush1.bf16.msra.mxu1 %v707_v8 }
   0x8   :  { %9 = vsyncpa [#allocation3], 0  ;;  %v709_v10 = vld [vmem:[%s988_s1 + $0x8] sm:$0xff]   ;;  %v710_v11 = vld [vmem:[%s988_s1 + $0x10] sm:$0xff]   ;;  %vm274_vm1 = vcmask 392192   ;;  %vm399_vm2 = vcmask 1040384  }
   0x9   :  { %vm473_vm3 = vcmask 1043456   ;;  %s650_s23 = sshll.u32 %s991_s4, 4  ;;  %s651_s23 = int_to_ptr.vmem [resolvable:$true] %s650_s23 }
   0xa   :  { %670 = vmatmul.mubr.msk.bf16.vlgmr.msra.gmra.mxu0 %vm88_vm0, %v708_v9  ;;  %673 = vmatmul.mubr.msk.bf16.vlgmr.msra.gmra.mxu1 %vm88_vm0, %v708_v9  ;;  %v711_v9 = vld [vmem:[%s989_s2] sm:$0xff]   ;;  %s739_s26 = scalar_lea.vmem %s651_s23, 16  ;;  %p744_p1 = scmp.lt.s32.totalorder %s651_s23, %s651_s23 }
   0xb   :  { %140 = vmatprep.mubr.bf16.mxu0 %v753_v2  ;;  %203 = vmatprep.mubr.bf16.mxu1 %v753_v2  ;;  %p740_p0 = scmp.ne.s32.totalorder %s651_s23, %s739_s26  ;;  %p745_p2 = scmp.lt.s32.totalorder %s739_s26, %s739_s26 }
   0xd   :  { %p746_p3 = por %p745_p2, %p744_p1 }
   0xf   :  { %p747_p4 = pnand %p746_p3, %p740_p0 }
  0x12   :  { %671 = vmatmul.mubr.msk.bf16.gmra.mxu0 %vm88_vm0, %v709_v10  ;;  %674 = vmatmul.mubr.msk.bf16.gmra.mxu1 %vm88_vm0, %v709_v10  ;;  %v712_v10 = vld [vmem:[%s989_s2 + $0x8] sm:$0xff]  }
  0x13   :  { %150 = vmatprep.mubr.bf16.mxu0 %v753_v2  ;;  %213 = vmatprep.mubr.bf16.mxu1 %v753_v2 }
  0x1a   :  { %672 = vmatmul.mubr.msk.bf16.gmra.mxu0 %vm88_vm0, %v710_v11  ;;  %675 = vmatmul.mubr.msk.bf16.gmra.mxu1 %vm88_vm0, %v710_v11  ;;  %v395_v11 = vld [vmem:[%s990_s3 + $0x60] sm:$0xff] }
  0x1b   :  { %313 = vmatprep.mubr.bf16.mxu0 %v753_v2  ;;  %364 = vmatprep.mubr.bf16.mxu1 %v753_v2 }
  0xca   :  { %v821_v12 = vpop.f32.mrf.mxu0  ;;  %v823_v13 = vpop.f32.mrf.mxu1 }
  0xcb   :  { %v226_v60 = vmax.f32 %v823_v13, 0.0  ;;  %v224_v6 = vmax.f32 %v821_v12, 0.0  ;;  %v396_v12 = vld [vmem:[%s990_s3 + $0x68] sm:$0xff]  ;;  %v397_v13 = vld [vmem:[%s990_s3 + $0x70] sm:$0xff] }
  0xcc   :  { %v134_v14 = vpop.f32.mrf.mxu0  ;;  %v197_v15 = vpop.f32.mrf.mxu1 }
  0xcd   :  { %v225_v61 = vmax.f32 %v134_v14, 0.0  ;;  %v227_v62 = vmax.f32 %v197_v15, 0.0  ;;  %v401_v14 = vsel %vm399_vm2, %v396_v12, 0.0 }
  0xce   :  { %v825_v16 = vpop.f32.mrf.mxu0  ;;  %v827_v17 = vpop.f32.mrf.mxu1 }
  0xcf   :  { %v228_v63 = vmax.f32 %v825_v16, 0.0  ;;  %v230_v0 = vmax.f32 %v827_v17, 0.0  ;;  %v403_v16 = vsel %vm399_vm2, %v397_v13, 0.0  ;;  %v398_v17 = vld [vmem:[%s990_s3 + $0x78] sm:$0xff] }
  0xd0   :  { %v138_v18 = vpop.f32.mrf.mxu0  ;;  %v201_v19 = vpop.f32.mrf.mxu1 }
  0xd1   :  { %v229_v55 = vmax.f32 %v138_v18, 0.0  ;;  %v231_v56 = vmax.f32 %v201_v19, 0.0  ;;  %v252_v7 = vpack.c.bf16 %v228_v63, %v224_v6  ;;  %v254_v8 = vpack.c.bf16 %v230_v0, %v226_v60 }
  0xd2   :  { %v142_v20 = vpop.f32.mrf.mxu0  ;;  %v205_v21 = vpop.f32.mrf.mxu1  ;;  %v405_v19 = vsel %vm399_vm2, %v398_v17, 0.0 }
  0xd3   :  { %v234_v45 = vmax.f32 %v205_v21, 0.0  ;;  %v232_v59 = vmax.f32 %v142_v20, 0.0  ;;  %v253_v4 = vpack.c.bf16 %v229_v55, %v225_v61  ;;  %v255_v5 = vpack.c.bf16 %v231_v56, %v227_v62 }
  0xd4   :  { %v144_v22 = vpop.f32.mrf.mxu0  ;;  %v207_v23 = vpop.f32.mrf.mxu1  ;;  %v440_v21 = vlaneseq }
  0xd5   :  { %v233_v47 = vmax.f32 %v144_v22, 0.0  ;;  %v235_v48 = vmax.f32 %v207_v23, 0.0  ;;  %v383_v23 = vld [vmem:[%s990_s3] sm:$0xff] }
  0xd6   :  { %v146_v24 = vpop.f32.mrf.mxu0  ;;  %v209_v25 = vpop.f32.mrf.mxu1  ;;  %v441_v22 = vshrl.u32 %v440_v21, 7 }
  0xd7   :  { %v236_v51 = vmax.f32 %v146_v24, 0.0  ;;  %v238_v52 = vmax.f32 %v209_v25, 0.0  ;;  %v385_v24 = vld [vmem:[%s990_s3 + $0x10] sm:$0xff] }
  0xd8   :  { %v148_v26 = vpop.f32.mrf.mxu0  ;;  %v211_v27 = vpop.f32.mrf.mxu1  ;;  %v442_v25 = vsub.s32 0, %v441_v22 }
  0xd9   :  { %v237_v34 = vmax.f32 %v148_v26, 0.0  ;;  %v239_v35 = vmax.f32 %v211_v27, 0.0  ;;  %v256_v1 = vpack.c.bf16 %v236_v51, %v232_v59  ;;  %v258_v3 = vpack.c.bf16 %v238_v52, %v234_v45 }
  0xda   :  { %v152_v28 = vpop.f32.mrf.mxu0  ;;  %v215_v29 = vpop.f32.mrf.mxu1  ;;  %v879_v45 = vrot.slane %v398_v17, %v442_v25 }
  0xdb   :  { %v242_v36 = vmax.f32 %v215_v29, 0.0  ;;  %v240_v46 = vmax.f32 %v152_v28, 0.0  ;;  %v257_v57 = vpack.c.bf16 %v237_v34, %v233_v47  ;;  %v259_v58 = vpack.c.bf16 %v239_v35, %v235_v48 }
  0xdc   :  { %v154_v30 = vpop.f32.mrf.mxu0  ;;  %v217_v31 = vpop.f32.mrf.mxu1  ;;  %v869_v34 = vrot.slane %v395_v11, %v442_v25  ;;  %v871_v35 = vrot.slane %v396_v12, %v442_v25 }
  0xdd   :  { %v241_v41 = vmax.f32 %v154_v30, 0.0  ;;  %v243_v42 = vmax.f32 %v217_v31, 0.0  ;;  %v384_v30 = vld [vmem:[%s990_s3 + $0x8] sm:$0xff]  ;;  %v386_v31 = vld [vmem:[%s990_s3 + $0x18] sm:$0xff] }
  0xde   :  { %v156_v32 = vpop.f32.mrf.mxu0  ;;  %v219_v33 = vpop.f32.mrf.mxu1 }
  0xdf   :  { %v244_v37 = vmax.f32 %v156_v32, 0.0  ;;  %v246_v38 = vmax.f32 %v219_v33, 0.0 }
  0xe0   :  { %v158_v39 = vpop.f32.mrf.mxu0  ;;  %v221_v40 = vpop.f32.mrf.mxu1 }
  0xe1   :  { %v245_v43 = vmax.f32 %v158_v39, 0.0  ;;  %v247_v44 = vmax.f32 %v221_v40, 0.0  ;;  %v260_v53 = vpack.c.bf16 %v244_v37, %v240_v46  ;;  %v262_v54 = vpack.c.bf16 %v246_v38, %v242_v36 }
  0xe3   :  { %v261_v49 = vpack.c.bf16 %v245_v43, %v241_v41  ;;  %v263_v50 = vpack.c.bf16 %v247_v44, %v243_v42  ;;  %v877_v44 = vrot.slane %v397_v13, %v442_v25 }
  0xe5   :  { %291 = vmatprep.subr.bf16.mxu0 %v261_v49  ;;  %342 = vmatprep.subr.bf16.mxu1 %v263_v50 }
  0xe6   :  { %292 = vmatpush1.bf16.msra.mxu0 %v260_v53  ;;  %343 = vmatpush1.bf16.msra.mxu1 %v262_v54 }
  0xe7   :  { %293 = vmatprep.subr.bf16.mxu0 %v257_v57  ;;  %344 = vmatprep.subr.bf16.mxu1 %v259_v58 }
  0xea   :  { %294 = vmatpush1.bf16.msra.mxu0 %v256_v1  ;;  %345 = vmatpush1.bf16.msra.mxu1 %v258_v3 }
  0xeb   :  { %295 = vmatprep.subr.bf16.mxu0 %v253_v4  ;;  %346 = vmatprep.subr.bf16.mxu1 %v255_v5 }
  0xee   :  { %296 = vmatpush1.bf16.msra.mxu0 %v252_v7  ;;  %347 = vmatpush1.bf16.msra.mxu1 %v254_v8 }
  0xf1   :  { %678 = vmatmul.mubr.msk.bf16.vlgmr.msra.gmra.mxu0 %vm274_vm1, %v711_v9  ;;  %680 = vmatmul.mubr.msk.bf16.vlgmr.msra.gmra.mxu1 %vm274_vm1, %v711_v9 }
  0xf2   :  { %323 = vmatprep.mubr.bf16.mxu0 %v753_v2  ;;  %374 = vmatprep.mubr.bf16.mxu1 %v753_v2  ;;  %v400_v2 = vsel %vm399_vm2, %v395_v11, 0.0 }
  0xf3   :  { %v402_v15 = vadd.f32 %v401_v14, %v400_v2 }
  0xf5   :  { %v404_v18 = vadd.f32 %v403_v16, %v402_v15 }
  0xf7   :  { %v406_v20 = vadd.f32 %v405_v19, %v404_v18 }
  0xf9   :  { %679 = vmatmul.mubr.msk.bf16.gmra.mxu0 %vm274_vm1, %v712_v10  ;;  %681 = vmatmul.mubr.msk.bf16.gmra.mxu1 %vm274_vm1, %v712_v10 }
  0xfa   :  { %407 = vadd.xlane.f32.xlu0 %v406_v20 }
 0x1b1   :  { %v315_v26 = vpop.f32.mrf.mxu0  ;;  %v366_v27 = vpop.f32.mrf.mxu1 }
 0x1b2   :  { %v412_v28 = vsub.f32 %v315_v26, %v383_v23  ;;  %v414_v29 = vsub.f32 %v366_v27, %v385_v24 }
 0x1b3   :  { %v317_v32 = vpop.f32.mrf.mxu0  ;;  %v368_v33 = vpop.f32.mrf.mxu1 }
 0x1b4   :  { %v416_v36 = vand.u32 2147483647, %v412_v28  ;;  %v424_v37 = vmul.f32 0.5, %v412_v28  ;;  %v418_v38 = vand.u32 2147483647, %v414_v29  ;;  %v426_v39 = vmul.f32 0.5, %v414_v29 }
 0x1b5   :  { %v413_v40 = vsub.f32 %v317_v32, %v384_v30  ;;  %v415_v41 = vsub.f32 %v368_v33, %v386_v31  ;;  %v873_v42 = vpop.f32.mrf.mxu0  ;;  %v875_v43 = vpop.f32.mrf.mxu1 }
 0x1b6   :  { %vm881_vm4 = vcmp.lt.f32.partialorder %v416_v36, 1.0  ;;  %v428_v47 = vmul.f32 %v424_v37, %v412_v28  ;;  %v682_v48 = vadd.f32 -0.5, %v416_v36  ;;  %vm885_vm5 = vcmp.lt.f32.partialorder %v418_v38, 1.0 }
 0x1b7   :  { %v430_v50 = vmul.f32 %v426_v39, %v414_v29  ;;  %v684_v51 = vadd.f32 -0.5, %v418_v38  ;;  %v417_v52 = vand.u32 2147483647, %v413_v40  ;;  %v425_v53 = vmul.f32 0.5, %v413_v40  ;;  %v889_v54 = vpop.f32.mrf.mxu0  ;;  %v891_v55 = vpop.f32.mrf.mxu1 }
 0x1b8   :  { %v419_v56 = vand.u32 2147483647, %v415_v41  ;;  %v427_v57 = vmul.f32 0.5, %v415_v41  ;;  %v474_v58 = vsel %vm473_vm3, %v873_v42, -inf  ;;  %v488_v59 = vsel %vm473_vm3, %v875_v43, -inf }
 0x1b9   :  { %vm897_vm6 = vcmp.lt.f32.partialorder %v417_v52, 1.0  ;;  %v429_v61 = vmul.f32 %v425_v53, %v413_v40  ;;  %v683_v62 = vadd.f32 -0.5, %v417_v52  ;;  %v475_v63 = vrot.slane %v474_v58, 4  ;;  %v325_v0 = vpop.f32.mrf.mxu0  ;;  %v376_v1 = vpop.f32.mrf.mxu1 }
 0x1ba   :  { %v431_v3 = vmul.f32 %v427_v57, %v415_v41  ;;  %v685_v4 = vadd.f32 -0.5, %v419_v56  ;;  %v489_v5 = vrot.slane %v488_v59, 4  ;;  %v481_v6 = vsel %vm473_vm3, %v889_v54, -inf }
 0x1bb   :  { %v476_v7 = vmax.f32 %v474_v58, %v475_v63  ;;  %v482_v8 = vrot.slane %v481_v6, 4  ;;  %v495_v9 = vsel %vm473_vm3, %v891_v55, -inf  ;;  %vm905_vm7 = vcmp.lt.f32.partialorder %v419_v56, 1.0  ;;  %v327_v11 = vpop.f32.mrf.mxu0  ;;  %v378_v12 = vpop.f32.mrf.mxu1 }
 0x1bc   :  { %v490_v13 = vmax.f32 %v488_v59, %v489_v5  ;;  %v496_v2 = vrot.slane %v495_v9, 4  ;;  %v436_v14 = vsel %vm881_vm4, %v428_v47, %v682_v48  ;;  %v437_v15 = vsel %vm897_vm6, %v429_v61, %v683_v62  ;;  %v408_v62 = vpop.xlane.xlu0 %407 }
 0x1bd   :  { %v477_v16 = vrot.slane %v476_v7, 2  ;;  %v483_v17 = vmax.f32 %v481_v6, %v482_v8  ;;  %v438_v18 = vsel %vm885_vm5, %v430_v50, %v684_v51  ;;  %v439_v19 = vsel %vm905_vm7, %v431_v3, %v685_v4  ;;  %v329_v20 = vpop.f32.mrf.mxu0  ;;  %v380_v21 = vpop.f32.mrf.mxu1  ;;  %v394_v3 = vld [vmem:[%s990_s3 + $0x58] sm:$0xff] }
 0x1be   :  { %v491_v22 = vrot.slane %v490_v13, 2  ;;  %v497_v23 = vmax.f32 %v495_v9, %v496_v2  ;;  %v456_v24 = vmul.f32 %v869_v34, %v436_v14  ;;  %v457_v25 = vmul.f32 %v871_v35, %v437_v15 }
 0x1bf   :  { %v478_v26 = vmax.f32 %v476_v7, %v477_v16  ;;  %v484_v27 = vrot.slane %v483_v17, 2  ;;  %v458_v28 = vmul.f32 %v877_v44, %v438_v18  ;;  %v330_v29 = vpop.f32.mrf.mxu0  ;;  %v381_v30 = vpop.f32.mrf.mxu1  ;;  %713 = vtanh.f32 %v325_v0  ;;  %v393_v0 = vld [vmem:[%s990_s3 + $0x50] sm:$0xff] }
 0x1c0   :  { %v492_v31 = vmax.f32 %v490_v13, %v491_v22  ;;  %v498_v32 = vrot.slane %v497_v23, 2  ;;  %v460_v33 = vadd.f32 %v457_v25, %v456_v24  ;;  %v459_v38 = vmul.f32 %v879_v45, %v439_v19 }
 0x1c1   :  { %v479_v36 = vrot.slane %v478_v26, 1  ;;  %v485_v37 = vmax.f32 %v483_v17, %v484_v27  ;;  %715 = vtanh.f32 %v327_v11  ;;  %v409_v63 = vmax.f32 %v408_v62, 1.0 }
 0x1c2   :  { %v493_v39 = vrot.slane %v492_v31, 1  ;;  %v499_v40 = vmax.f32 %v497_v23, %v498_v32  ;;  %v461_v41 = vadd.f32 %v460_v33, %v458_v28  ;;  %717 = vtanh.f32 %v376_v1 }
 0x1c3   :  { %v480_v46 = vmax.f32 %v478_v26, %v479_v36  ;;  %v486_v47 = vrot.slane %v485_v37, 1  ;;  %719 = vtanh.f32 %v378_v12 }
 0x1c4   :  { %v494_v48 = vmax.f32 %v492_v31, %v493_v39  ;;  %v500_v49 = vrot.slane %v499_v40, 1  ;;  %v462_v50 = vadd.f32 %v461_v41, %v459_v38 }
 0x1c5   :  { %v922_v51 = vsub.f32 %v873_v42, %v480_v46  ;;  %v487_v52 = vmax.f32 %v485_v37, %v486_v47 }
 0x1c6   :  { %v925_v53 = vsub.f32 %v875_v43, %v494_v48  ;;  %v501_v56 = vmax.f32 %v499_v40, %v500_v49  ;;  %463 = vadd.xlane.f32.xlu0 %v462_v50  ;;  %v391_v43 = vld [vmem:[%s990_s3 + $0x40] sm:$0xff] }
 0x1c7   :  { %v506_v57 = vmul.f32 1.442695, %v922_v51  ;;  %v929_v58 = vsub.f32 %v889_v54, %v487_v52  ;;  %v392_v54 = vld [vmem:[%s990_s3 + $0x48] sm:$0xff] }
 0x1c8   :  { %v510_v59 = vmul.f32 1.442695, %v925_v53  ;;  %v933_v60 = vsub.f32 %v891_v55, %v501_v56 }
 0x1c9   :  { %721 = vpow2.f32 %v506_v57  ;;  %v508_v42 = vmul.f32 1.442695, %v929_v58 }
 0x1ca   :  { %723 = vpow2.f32 %v510_v59  ;;  %v512_v61 = vmul.f32 1.442695, %v933_v60 }
 0x1cb   :  { %725 = vpow2.f32 %v508_v42 }
 0x1cc   :  { %727 = vpow2.f32 %v512_v61  ;;  %v714_v55 = vpop.eup %713 }
 0x1cd   :  { %v610_v4 = vsub.f32 %v714_v55, %v391_v43  ;;  %729 = vrcp.f32 %v409_v63 }
 0x1ce   :  { %v716_v1 = vpop.eup %715 }
 0x1cf   :  { %v718_v5 = vpop.eup %717  ;;  %v611_v6 = vsub.f32 %v716_v1, %v392_v54  ;;  %v614_v9 = vmul.f32 %v610_v4, %v610_v4  ;;  %v387_v54 = vld [vmem:[%s990_s3 + $0x20] sm:$0xff]  ;;  %v389_v1 = vld [vmem:[%s990_s3 + $0x30] sm:$0xff] }
 0x1d0   :  { %v720_v7 = vpop.eup %719  ;;  %v612_v8 = vsub.f32 %v718_v5, %v393_v0  ;;  %v388_v5 = vld [vmem:[%s990_s3 + $0x28] sm:$0xff] }
 0x1d1   :  { %v613_v10 = vsub.f32 %v720_v7, %v394_v3  ;;  %v615_v11 = vmul.f32 %v611_v6, %v611_v6  ;;  %v618_v13 = vmul.f32 %v614_v9, %v869_v34  ;;  %v390_v9 = vld [vmem:[%s990_s3 + $0x38] sm:$0xff] }
 0x1d2   :  { %v616_v12 = vmul.f32 %v612_v8, %v612_v8 }
 0x1d3   :  { %v617_v2 = vmul.f32 %v613_v10, %v613_v10  ;;  %v619_v14 = vmul.f32 %v615_v11, %v871_v35 }
 0x1d4   :  { %v620_v15 = vmul.f32 %v616_v12, %v877_v44 }
 0x1d5   :  { %v621_v16 = vmul.f32 %v617_v2, %v879_v45  ;;  %v622_v17 = vadd.f32 %v619_v14, %v618_v13 }
 0x1d6   :  { %v722_v18 = vpop.eup %721 }
 0x1d7   :  { %v724_v19 = vpop.eup %723  ;;  %v514_v20 = vsel %vm473_vm3, %v722_v18, 0.0  ;;  %v623_v21 = vadd.f32 %v622_v17, %v620_v15 }
 0x1d8   :  { %v726_v22 = vpop.eup %725  ;;  %v515_v23 = vrot.slane %v514_v20, 4  ;;  %v528_v24 = vsel %vm473_vm3, %v724_v19, 0.0 }
 0x1d9   :  { %v728_v25 = vpop.eup %727  ;;  %v529_v26 = vrot.slane %v528_v24, 4  ;;  %v521_v34 = vsel %vm473_vm3, %v726_v22, 0.0  ;;  %v956_v27 = vadd.f32 %v623_v21, %v621_v16 }
 0x1da   :  { %v516_v35 = vadd.f32 %v515_v23, %v514_v20  ;;  %v522_v44 = vrot.slane %v521_v34, 4  ;;  %v535_v45 = vsel %vm473_vm3, %v728_v25, 0.0  ;;  %v730_v28 = vpop.eup %729 }
 0x1db   :  { %v530_v29 = vadd.f32 %v529_v26, %v528_v24  ;;  %v536_v30 = vrot.slane %v535_v45, 4  ;;  %686 = vpush %v730_v28 }
 0x1dc   :  { %v517_v31 = vrot.slane %v516_v35, 2  ;;  %v523_v32 = vadd.f32 %v522_v44, %v521_v34 }
 0x1dd   :  { %v531_v33 = vrot.slane %v530_v29, 2  ;;  %v537_v36 = vadd.f32 %v536_v30, %v535_v45 }
 0x1de   :  { %v518_v37 = vadd.f32 %v517_v31, %v516_v35  ;;  %v524_v38 = vrot.slane %v523_v32, 2 }
 0x1df   :  { %v532_v39 = vadd.f32 %v531_v33, %v530_v29  ;;  %v538_v40 = vrot.slane %v537_v36, 2 }
 0x1e0   :  { %v519_v41 = vrot.slane %v518_v37, 1  ;;  %v525_v46 = vadd.f32 %v524_v38, %v523_v32 }
 0x1e1   :  { %v533_v47 = vrot.slane %v532_v39, 1  ;;  %v539_v48 = vadd.f32 %v538_v40, %v537_v36 }
 0x1e2   :  { %v520_v49 = vadd.f32 %v519_v41, %v518_v37  ;;  %v526_v50 = vrot.slane %v525_v46, 1 }
 0x1e3   :  { %v534_v52 = vadd.f32 %v533_v47, %v532_v39  ;;  %v540_v56 = vrot.slane %v539_v48, 1 }
 0x1e4   :  { %731 = vlog2.f32 %v520_v49  ;;  %v527_v57 = vadd.f32 %v526_v50, %v525_v46 }
 0x1e5   :  { %733 = vlog2.f32 %v534_v52  ;;  %v541_v59 = vadd.f32 %v540_v56, %v539_v48 }
 0x1e6   :  { %735 = vlog2.f32 %v527_v57 }
 0x1e7   :  { %737 = vlog2.f32 %v541_v59 }
 0x1f1   :  { %v732_v42 = vpop.eup %731 }
 0x1f2   :  { %v734_v61 = vpop.eup %733  ;;  %v543_v43 = vmul.f32 0.6931472, %v732_v42 }
 0x1f3   :  { %v736_v62 = vpop.eup %735  ;;  %v547_v63 = vmul.f32 0.6931472, %v734_v61 }
 0x1f4   :  { %v738_v55 = vpop.eup %737  ;;  %v550_v0 = vsub.f32 %v922_v51, %v543_v43  ;;  %v545_v3 = vmul.f32 0.6931472, %v736_v62 }
 0x1f5   :  { %v552_v4 = vsub.f32 %v925_v53, %v547_v63  ;;  %v549_v6 = vmul.f32 0.6931472, %v738_v55 }
 0x1f6   :  { %v554_v7 = vmul.f32 %v550_v0, %v387_v54  ;;  %v551_v8 = vsub.f32 %v929_v58, %v545_v3 }
 0x1f7   :  { %v556_v51 = vmul.f32 %v552_v4, %v389_v1  ;;  %v553_v10 = vsub.f32 %v933_v60, %v549_v6 }
 0x1f8   :  { %v558_v11 = vsel %vm473_vm3, %v554_v7, 0.0  ;;  %v555_v12 = vmul.f32 %v551_v8, %v388_v5 }
 0x1f9   :  { %v559_v13 = vrot.slane %v558_v11, 4  ;;  %v572_v53 = vsel %vm473_vm3, %v556_v51, 0.0  ;;  %v557_v2 = vmul.f32 %v553_v10, %v390_v9 }
 0x1fa   :  { %v573_v14 = vrot.slane %v572_v53, 4  ;;  %v565_v15 = vsel %vm473_vm3, %v555_v12, 0.0 }
 0x1fb   :  { %v560_v16 = vadd.f32 %v559_v13, %v558_v11  ;;  %v566_v17 = vrot.slane %v565_v15, 4  ;;  %v579_v58 = vsel %vm473_vm3, %v557_v2, 0.0 }
 0x1fc   :  { %v574_v18 = vadd.f32 %v573_v14, %v572_v53  ;;  %v580_v19 = vrot.slane %v579_v58, 4 }
 0x1fd   :  { %v561_v20 = vrot.slane %v560_v16, 2  ;;  %v567_v21 = vadd.f32 %v566_v17, %v565_v15 }
 0x1fe   :  { %v575_v22 = vrot.slane %v574_v18, 2  ;;  %v581_v60 = vadd.f32 %v580_v19, %v579_v58 }
 0x1ff   :  { %v568_v23 = vrot.slane %v567_v21, 2  ;;  %v562_v24 = vadd.f32 %v561_v20, %v560_v16 }
 0x200   :  { %v576_v25 = vadd.f32 %v575_v22, %v574_v18  ;;  %v582_v26 = vrot.slane %v581_v60, 2 }
 0x201   :  { %v563_v34 = vrot.slane %v562_v24, 1  ;;  %v569_v35 = vadd.f32 %v568_v23, %v567_v21 }
 0x202   :  { %v577_v44 = vrot.slane %v576_v25, 1  ;;  %v583_v45 = vadd.f32 %v582_v26, %v581_v60 }
 0x203   :  { %v564_v28 = vadd.f32 %v563_v34, %v562_v24  ;;  %v570_v29 = vrot.slane %v569_v35, 1 }
 0x204   :  { %v578_v30 = vadd.f32 %v577_v44, %v576_v25  ;;  %v584_v31 = vrot.slane %v583_v45, 1 }
 0x205   :  { %v571_v32 = vadd.f32 %v570_v29, %v569_v35  ;;  %v586_v33 = vsub.f32 0.0, %v564_v28 }
 0x206   :  { %v585_v36 = vadd.f32 %v584_v31, %v583_v45  ;;  %v588_v38 = vsub.f32 0.0, %v578_v30 }
 0x207   :  { %v587_v37 = vsub.f32 0.0, %v571_v32  ;;  %v590_v40 = vsel %vm399_vm2, %v586_v33, 0.0 }
 0x208   :  { %v589_v39 = vsub.f32 0.0, %v585_v36  ;;  %v593_v47 = vsel %vm399_vm2, %v588_v38, 0.0 }
 0x209   :  { %v591_v41 = vsel %vm399_vm2, %v587_v37, 0.0 }
 0x20a   :  { %v592_v46 = vadd.f32 %v591_v41, %v590_v40  ;;  %v595_v49 = vsel %vm399_vm2, %v589_v39, 0.0 }
 0x20c   :  { %v594_v48 = vadd.f32 %v593_v47, %v592_v46  ;;  %s687_s3 = spop %686 }
 0x20e   :  { %v596_v50 = vadd.f32 %v595_v49, %v594_v48 }
 0x210   :  { %597 = vadd.xlane.f32.xlu1 %v596_v50 }
 0x214   :  { %625 = vadd.xlane.f32.xlu1 %v956_v27 }
 0x24f   :  { %v464_v52 = vpop.xlane.xlu0 %463 }
 0x250   :  { %v465_v56 = vrot.slane %v464_v52, 4 }
 0x252   :  { %v466_v57 = vadd.f32 %v465_v56, %v464_v52 }
 0x254   :  { %v467_v59 = vrot.slane %v466_v57, 2 }
 0x256   :  { %v468_v42 = vadd.f32 %v467_v59, %v466_v57 }
 0x258   :  { %v469_v61 = vrot.slane %v468_v42, 1 }
 0x25a   :  { %v470_v43 = vadd.f32 %v469_v61, %v468_v42 }
 0x25c   :  { %688 = vpush %v470_v43 }
 0x28d   :  { %s689_s16 = spop %688 }
 0x28e   :  { %s472_s17 = smul.f32 1.5, %s689_s16 }
 0x290   :  { %s635_s18 = smul.f32 %s687_s3, %s472_s17 }
 0x292   :  { %637 = sst [smem:[#allocation2]] %s635_s18 }
 0x299   :  { %v598_v62 = vpop.xlane.xlu1 %597 }
 0x29a   :  { %v599_v54 = vrot.slane %v598_v62, 4 }
 0x29c   :  { %v600_v63 = vadd.f32 %v599_v54, %v598_v62 }
 0x29d   :  { %v626_v55 = vpop.xlane.xlu1 %625 }
 0x29e   :  { %v601_v0 = vrot.slane %v600_v63, 2  ;;  %v627_v1 = vrot.slane %v626_v55, 4 }
 0x2a0   :  { %v628_v27 = vadd.f32 %v627_v1, %v626_v55  ;;  %v602_v3 = vadd.f32 %v601_v0, %v600_v63 }
 0x2a2   :  { %v629_v4 = vrot.slane %v628_v27, 2  ;;  %v603_v5 = vrot.slane %v602_v3, 1 }
 0x2a4   :  { %v630_v6 = vadd.f32 %v629_v4, %v628_v27  ;;  %v604_v7 = vadd.f32 %v603_v5, %v602_v3 }
 0x2a6   :  { %690 = vpush %v604_v7  ;;  %v631_v8 = vrot.slane %v630_v6, 1 }
 0x2a8   :  { %v632_v9 = vadd.f32 %v631_v8, %v630_v6 }
 0x2aa   :  { %692 = vpush %v632_v9 }
 0x2d7   :  { %s691_s2 = spop %690 }
 0x2d8   :  { %s638_s19 = smul.f32 %s691_s2, %s687_s3 }
 0x2da   :  { %640 = sst [smem:[#allocation2 + $0x1]] %s638_s19 }
 0x2db   :  { %s693_s20 = spop %692 }
 0x2dc   :  { %s634_s24 = smul.f32 6.125, %s693_s20 }
 0x2de   :  { %s641_s25 = smul.f32 %s687_s3, %s634_s24 }
 0x2e0   :  { %643 = sst [smem:[#allocation2 + $0x2]] %s641_s25 }
 0x2e1   :  { %750 = shalt.err (!%p747_p4)
}
 0x2e2   :  { %s754_s27 = smov [#allocation2]  }
 0x2e3   :  { %653 = dma.smem_to_vmem %s754_s27, 16, %s651_s23, [#allocation3]  }
 0x2e4   :  { %751 = dma.done.wait [#allocation3], 16  }
 0x2e5   :  { %752 = vsyncadd [#allocation3], 4294967280 }
 0x2e6   :  { %657 = sfence }
 0x2e7   :  { %658 = vsyncpa [#allocation3], 1 }

</bundles_post_ra>
